<compile_context>
chip_gen: v6e
topology: v6e:2x2x1
jax: 0.10.0
libtpu: 0.0.40
codegen_flags: <defaults>
</compile_context>

<pallas_src>
import functools

import jax
import jax.numpy as jnp
from jax.experimental import pallas as pl
from jax.experimental.pallas import tpu as pltpu

HIDDEN = 64


def qnet_kernel(x_ref, w1_ref, b1_ref, w2_ref, b2_ref, out_ref):
    # fc1: (TB, S) @ (S, 64), f32 accumulation on the MXU.
    h = jnp.dot(x_ref[...], w1_ref[...], preferred_element_type=jnp.float32)
    # Bias + relu on the VPU (free filler under the MXU/DMA critical path).
    h = jnp.maximum(h + b1_ref[...], 0.0)
    # fc2: cast activations to the weights' dtype (bf16) for the native MXU path,
    # keep f32 accumulation.
    y = jnp.dot(h.astype(w2_ref.dtype), w2_ref[...],
                preferred_element_type=jnp.float32)
    out_ref[...] = (y + b2_ref[...]).astype(out_ref.dtype)


def _round_up(n, m):
    return ((n + m - 1) // m) * m


@functools.partial(jax.jit, static_argnames=("block_b",))
def qnetwork_forward(x, w1, b1, w2, b2, *, block_b=1024):
    """QNetwork forward pass: fc2(relu(fc1(x))).

    x : (B, state_dim) f32
    w1: (state_dim, 64), b1: (1, 64)
    w2: (64, action_dim), b2: (1, action_dim)
    Returns (B, action_dim) f32.
    """
    B, state_dim = x.shape
    hidden, action_dim = w2.shape

    # bf16 activations/weights at the boundary; f32 biases and accumulation.
    x_bf = x.astype(jnp.bfloat16)
    w1_bf = w1.astype(jnp.bfloat16)
    w2_bf = w2.astype(jnp.bfloat16)
    b1_f32 = b1.astype(jnp.float32)
    b2_f32 = b2.astype(jnp.float32)

    # Batch tile: at most block_b rows, at least a sublane multiple (8).
    tb = min(block_b, _round_up(max(B, 1), 8))
    b_pad = _round_up(B, tb)
    if b_pad != B:
        x_bf = jnp.pad(x_bf, ((0, b_pad - B), (0, 0)))

    grid = (b_pad // tb,)

    out = pl.pallas_call(
        qnet_kernel,
        out_shape=jax.ShapeDtypeStruct((b_pad, action_dim), jnp.float32),
        grid=grid,
        in_specs=[
            pl.BlockSpec((tb, state_dim), lambda i: (i, 0)),       # x: pipelined tiles
            pl.BlockSpec((state_dim, hidden), lambda i: (0, 0)),   # w1: VMEM-resident
            pl.BlockSpec((1, hidden), lambda i: (0, 0)),           # b1
            pl.BlockSpec((hidden, action_dim), lambda i: (0, 0)),  # w2
            pl.BlockSpec((1, action_dim), lambda i: (0, 0)),       # b2
        ],
        out_specs=pl.BlockSpec((tb, action_dim), lambda i: (i, 0)),
        compiler_params=pltpu.CompilerParams(
            # Batch axis is embarrassingly parallel -> lets v7x shard grid
            # steps across both TensorCores; no-op on single-TC v5e/v6e.
            dimension_semantics=("parallel",),
        ),
    )(x_bf, w1_bf, b1_f32, w2_bf, b2_f32)

    return out[:B]


def init_params(key, state_dim, action_dim, hidden=HIDDEN):
    """Deterministic synthetic init matching nn.Linear shapes.

    PyTorch stores fc.weight as (out_features, in_features); we store the
    transpose so the kernel can do x @ W directly.
    """
    k1, k2, k3, k4 = jax.random.split(key, 4)
    s1 = 1.0 / jnp.sqrt(state_dim)   # U(-1/sqrt(fan_in), 1/sqrt(fan_in))
    s2 = 1.0 / jnp.sqrt(hidden)
    w1 = jax.random.uniform(k1, (state_dim, hidden), jnp.float32, -s1, s1)
    b1 = jax.random.uniform(k2, (1, hidden), jnp.float32, -s1, s1)
    w2 = jax.random.uniform(k3, (hidden, action_dim), jnp.float32, -s2, s2)
    b2 = jax.random.uniform(k4, (1, action_dim), jnp.float32, -s2, s2)
    return w1, b1, w2, b2


def _ref_forward(x, w1, b1, w2, b2):
    return jnp.maximum(x @ w1 + b1, 0.0) @ w2 + b2


if __name__ == "__main__":
    key = jax.random.PRNGKey(0)
    kx, kp, kx2 = jax.random.split(key, 3)

    state_dim = 8
    action_dim = 4

    # Small sanity test (single grid step, batch < tile).
    batch = 8
    x = jax.random.normal(kx, (batch, state_dim), dtype=jnp.float32)
    w1, b1, w2, b2 = init_params(kp, state_dim, action_dim)

    out = jax.block_until_ready(qnetwork_forward(x, w1, b1, w2, b2))
    ref = _ref_forward(x, w1, b1, w2, b2)
    assert out.shape == (batch, action_dim)
    # bf16 activations/weights -> loosened tolerance vs. pure-f32 reference.
    assert jnp.allclose(out, ref, atol=3e-2, rtol=3e-2), (
        f"max abs err {jnp.max(jnp.abs(out - ref))}")

    # Larger, non-tile-multiple batch: exercises the batch grid, pipelining,
    # and padding/slicing path.
    big_batch = 2500
    xb = jax.random.normal(kx2, (big_batch, state_dim), dtype=jnp.float32)
    outb = jax.block_until_ready(qnetwork_forward(xb, w1, b1, w2, b2))
    refb = _ref_forward(xb, w1, b1, w2, b2)
    assert outb.shape == (big_batch, action_dim)
    assert jnp.allclose(outb, refb, atol=3e-2, rtol=3e-2), (
        f"max abs err {jnp.max(jnp.abs(outb - refb))}")

    print("KERNEL_OK")
</pallas_src>

<mosaic_0001>
module attributes {stable_mosaic.version = 11 : i64} {
  func.func @qnet_kernel(%arg0: i32, %arg1: memref<8x8xbf16, #tpu.memory_space<vmem>>, %arg2: memref<8x64xbf16, #tpu.memory_space<vmem>>, %arg3: memref<1x64xf32, #tpu.memory_space<vmem>>, %arg4: memref<64x4xbf16, #tpu.memory_space<vmem>>, %arg5: memref<1x4xf32, #tpu.memory_space<vmem>>, %arg6: memref<8x4xf32, #tpu.memory_space<vmem>>) attributes {dimension_semantics = [#tpu.dimension_semantics<parallel>], iteration_bounds = array<i64: 1>, scalar_prefetch = 0 : i64, scratch_operands = 0 : i64, tpu.core_type = #tpu.core_type<tc>, window_params = [{transform_indices = @transform_0, window_bounds = array<i64: 8, 8>}, {pipeline_mode = #tpu.pipeline_mode<synchronous>, transform_indices = @transform_1, window_bounds = array<i64: 8, 64>}, {pipeline_mode = #tpu.pipeline_mode<synchronous>, transform_indices = @transform_2, window_bounds = array<i64: 1, 64>}, {pipeline_mode = #tpu.pipeline_mode<synchronous>, transform_indices = @transform_3, window_bounds = array<i64: 64, 4>}, {pipeline_mode = #tpu.pipeline_mode<synchronous>, transform_indices = @transform_4, window_bounds = array<i64: 1, 4>}, {transform_indices = @transform_5, window_bounds = array<i64: 8, 4>}]} {
    %c0 = arith.constant 0 : index
    %c0_0 = arith.constant 0 : index
    %0 = vector.load %arg1[%c0, %c0_0] : memref<8x8xbf16, #tpu.memory_space<vmem>>, vector<8x8xbf16>
    %c0_1 = arith.constant 0 : index
    %c0_2 = arith.constant 0 : index
    %1 = vector.load %arg2[%c0_1, %c0_2] : memref<8x64xbf16, #tpu.memory_space<vmem>>, vector<8x64xbf16>
    %cst = arith.constant dense<0.000000e+00> : vector<8x64xf32>
    %2 = tpu.matmul %0, %1, %cst {dimension_numbers = #tpu.dot_dimension_numbers<[1], [0], [0], [1], [0, 0, 1, 1], [], []>} : vector<8x8xbf16>, vector<8x64xbf16>, vector<8x64xf32> -> vector<8x64xf32>
    %c0_3 = arith.constant 0 : index
    %c0_4 = arith.constant 0 : index
    %3 = vector.load %arg3[%c0_3, %c0_4] : memref<1x64xf32, #tpu.memory_space<vmem>>, vector<1x64xf32>
    %4 = vector.broadcast %3 : vector<1x64xf32> to vector<8x64xf32>
    %5 = arith.addf %2, %4 : vector<8x64xf32>
    %cst_5 = arith.constant 0.000000e+00 : f32
    %6 = vector.broadcast %cst_5 : f32 to vector<8x64xf32>
    %7 = arith.maximumf %5, %6 : vector<8x64xf32>
    %8 = arith.truncf %7 : vector<8x64xf32> to vector<8x64xbf16>
    %c0_6 = arith.constant 0 : index
    %c0_7 = arith.constant 0 : index
    %9 = vector.load %arg4[%c0_6, %c0_7] : memref<64x4xbf16, #tpu.memory_space<vmem>>, vector<64x4xbf16>
    %cst_8 = arith.constant dense<0.000000e+00> : vector<8x4xf32>
    %10 = tpu.matmul %8, %9, %cst_8 {dimension_numbers = #tpu.dot_dimension_numbers<[1], [0], [0], [1], [0, 0, 1, 1], [], []>} : vector<8x64xbf16>, vector<64x4xbf16>, vector<8x4xf32> -> vector<8x4xf32>
    %c0_9 = arith.constant 0 : index
    %c0_10 = arith.constant 0 : index
    %11 = vector.load %arg5[%c0_9, %c0_10] : memref<1x4xf32, #tpu.memory_space<vmem>>, vector<1x4xf32>
    %12 = vector.broadcast %11 : vector<1x4xf32> to vector<8x4xf32>
    %13 = arith.addf %10, %12 : vector<8x4xf32>
    %c0_11 = arith.constant 0 : index
    %c0_12 = arith.constant 0 : index
    %14 = vector.load %arg6[%c0_11, %c0_12] : memref<8x4xf32, #tpu.memory_space<vmem>>, vector<8x4xf32>
    tpu.vector_store %arg6[%c0_11, %c0_12], %13 {strides = array<i32>} : memref<8x4xf32, #tpu.memory_space<vmem>>, vector<8x4xf32>,
    return
  }
  func.func @transform_0(%arg0: i32) -> (i32, i32) {
    %c0_i32 = arith.constant 0 : i32
    %c0_i32_0 = arith.constant 0 : i32
    return %arg0, %c0_i32 : i32, i32
  }
  func.func @transform_1(%arg0: i32) -> (i32, i32) {
    %c0_i32 = arith.constant 0 : i32
    %c0_i32_0 = arith.constant 0 : i32
    %c0_i32_1 = arith.constant 0 : i32
    return %c0_i32, %c0_i32_0 : i32, i32
  }
  func.func @transform_2(%arg0: i32) -> (i32, i32) {
    %c0_i32 = arith.constant 0 : i32
    %c0_i32_0 = arith.constant 0 : i32
    %c0_i32_1 = arith.constant 0 : i32
    return %c0_i32, %c0_i32_0 : i32, i32
  }
  func.func @transform_3(%arg0: i32) -> (i32, i32) {
    %c0_i32 = arith.constant 0 : i32
    %c0_i32_0 = arith.constant 0 : i32
    %c0_i32_1 = arith.constant 0 : i32
    return %c0_i32, %c0_i32_0 : i32, i32
  }
  func.func @transform_4(%arg0: i32) -> (i32, i32) {
    %c0_i32 = arith.constant 0 : i32
    %c0_i32_0 = arith.constant 0 : i32
    %c0_i32_1 = arith.constant 0 : i32
    return %c0_i32, %c0_i32_0 : i32, i32
  }
  func.func @transform_5(%arg0: i32) -> (i32, i32) {
    %c0_i32 = arith.constant 0 : i32
    %c0_i32_0 = arith.constant 0 : i32
    return %arg0, %c0_i32 : i32, i32
  }
}

</mosaic_0001>

<bundles_post_ra>
// kernel: qnetwork_forward.1
= control target key start
LH: loop header
LB: loop body
LE: loop exit
PB: predicated region body
PF: predicated region fallthrough
CT: control target
= control target key end

     0   :  { %vm34_vm0 = vcmask 1043456   ;;  %v208_v0 = vmov 0.0   ;;  %vm209_vm1 = vmmov 0   ;;  %vm30_vm2 = vcmask 64512   ;;  %s267_s1 = inlined_call_operand.vmem [shape: bf16[8,64], index: 1, kind: input, shape index: {}]   ;;  %s268_s0 = inlined_call_operand.vmem [shape: bf16[8,8], index: 0, kind: input, shape index: {}]   ;;  %s269_s3 = inlined_call_operand.vmem [shape: bf16[64,4], index: 3, kind: input, shape index: {}]   ;;  %s270_s2 = inlined_call_operand.vmem [shape: f32[1,64], index: 2, kind: input, shape index: {}]   ;;  %s271_s4 = inlined_call_operand.vmem [shape: f32[1,4], index: 4, kind: input, shape index: {}]   ;;  %s272_s5 = inlined_call_operand.vmem [shape: f32[8,4], index: 5, kind: output, shape index: {}]  }
   0x1   :  { %184 = vmatprep.subr.bf16.mxu0 %v208_v0  ;;  %v22_v1 = vld [vmem:[%s267_s1] sm:$0xf]  ;;  %186 = vmatprep.mubr.msk.bf16.mxu0 %vm209_vm1, %v208_v0  ;;  %v204_v3 = vld [vmem:[%s269_s3 + $0x18] sm:$0xff]   ;;  %v205_v5 = vld [vmem:[%s269_s3 + $0x10] sm:$0xff]   ;;  %vm119_vm3 = vcmask 523264   ;;  %vm163_vm4 = vcmask 31744  }
   0x2   :  { %v36_v2 = vsel %vm34_vm0, %v22_v1, 0  ;;  %190 = vmatprep.subr.bf16.mxu1 %v208_v0  ;;  %198 = vmatprep.mubr.msk.bf16.mxu1 %vm209_vm1, %v208_v0  ;;  %v21_v4 = vld [vmem:[%s268_s0] sm:$0xf]  ;;  %v206_v6 = vld [vmem:[%s269_s3 + $0x8] sm:$0xff]  }
   0x3   :  { %185 = vmatpush3.bf16.msra.mxu0 %v36_v2  ;;  %191 = vmatpush3.bf16.msra.mxu1 %v204_v3  ;;  %v207_v7 = vld [vmem:[%s269_s3] sm:$0xff]  }
   0x4   :  { %192 = vmatprep.subr.bf16.mxu1 %v208_v0  ;;  %v169_v8 = vld [vmem:[%s270_s2] ss:$0 sm:$0xff] }
   0x5   :  { %v171_v16 = vld [vmem:[%s271_s4] ss:$0 sm:$0xff] }
   0x6   :  { %187 = vmatmul.mubr.msk.bf16.vlgmr.msra.gmra.mxu0 %vm30_vm2, %v21_v4 }
   0x7   :  { %193 = vmatpush3.bf16.msra.mxu1 %v205_v5 }
   0x8   :  { %194 = vmatprep.subr.bf16.mxu1 %v208_v0 }
   0xb   :  { %195 = vmatpush3.bf16.msra.mxu1 %v206_v6 }
   0xc   :  { %196 = vmatprep.subr.bf16.mxu1 %v208_v0 }
   0xf   :  { %197 = vmatpush3.bf16.msra.mxu1 %v207_v7 }
  0xc6   :  { %v72_v9 = vpop.f32.mrf.mxu0 }
  0xc7   :  { %v73_v10 = vadd.f32 %v169_v8, %v72_v9 }
  0xc8   :  { %v188_v11 = vpop.f32.mrf.mxu0 }
  0xc9   :  { %v78_v12 = vmax.f32 %v73_v10, 0.0 }
  0xca   :  { %v75_v13 = vpop.f32.mrf.mxu0 }
  0xcb   :  { %v79_v14 = vpack.c.bf16 %v78_v12, %v78_v12 }
  0xcc   :  { %v189_v15 = vpop.f32.mrf.mxu0 }
  0xcd   :  { %199 = vmatmul.mubr.msk.bf16.vlgmr.msra.gmra.mxu1 %vm119_vm3, %v79_v14 }
 0x18d   :  { %v157_v17 = vpop.f32.mrf.mxu1 }
 0x18e   :  { %v158_v18 = vadd.f32 %v171_v16, %v157_v17 }
 0x18f   :  { %v200_v19 = vpop.f32.mrf.mxu1 }
 0x190   :  { %164 = vst.msk [vmem:[%s272_s5] sm:$0xff] %vm163_vm4, %v158_v18 }
 0x191   :  { %v160_v20 = vpop.f32.mrf.mxu1 }
 0x193   :  { %v201_v21 = vpop.f32.mrf.mxu1 }

</bundles_post_ra>
